<compile_context>
chip_gen: v5e
topology: v5e:2x2
jax: 0.10.0
libtpu: 0.0.40
codegen_flags: <defaults>
</compile_context>

<pallas_src>
import jax
import jax.numpy as jnp
from jax.experimental import pallas as pl
from jax.experimental.pallas import tpu as pltpu


def _round_up(x, m):
    return ((x + m - 1) // m) * m


def _sublane(dtype):
    # Sublane packing: 8 rows/vreg for 4-byte, 16 for 2-byte, 32 for 1-byte dtypes.
    return max(8, 32 // jnp.dtype(dtype).itemsize)


def _make_gate_kernel(tn, n_col_tiles, low_precision_tail):
    def gate_kernel(focal_ref, extra_ref, wf_ref, bf_ref, we_ref, o_ref):
        # focal_ref: (TM, Df), extra_ref: (TM, De)
        # wf_ref: (Df, TN), bf_ref: (1, TN), we_ref: (De, TN), o_ref: (TM, TN)
        f = focal_ref[...]
        x = extra_ref[...]
        wf = wf_ref[...]
        we = we_ref[...]

        # Activations cast to the (pre-cast) weight dtype only if needed.
        fm = f if f.dtype == wf.dtype else f.astype(wf.dtype)
        xm = x if x.dtype == we.dtype else x.astype(we.dtype)

        # focal @ Wf + extra @ We + bf   (f32 accumulation on the MXU)
        z = jnp.dot(fm, wf, preferred_element_type=jnp.float32)
        z = z + jnp.dot(xm, we, preferred_element_type=jnp.float32)
        z = z + bf_ref[...].astype(jnp.float32)

        # dropout -> identity (inference).
        # sigmoid(z) = 1 / (1 + exp(-z)); exp and approx reciprocal both run on
        # the EUP slot (effectively free alongside the VALU work).
        g = pl.reciprocal(1.0 + jnp.exp(-z), approx=True)

        # Columns of focal matching this output (lane) tile.
        if n_col_tiles == 1:
            f_cols = f
        else:
            col = pl.multiple_of(pl.program_id(1) * tn, tn)
            f_cols = focal_ref[:, pl.ds(col, tn)]

        if low_precision_tail:
            # bf16-native VALU path on v6e/v7x: keep the elementwise tail narrow.
            o_ref[...] = g.astype(o_ref.dtype) * f_cols.astype(o_ref.dtype)
        else:
            o_ref[...] = (g * f_cols.astype(jnp.float32)).astype(o_ref.dtype)

    return gate_kernel


def gate(focal, extra, wf, bf, we, *, block_rows=1024, block_cols=512,
         matmul_dtype=None, vmem_budget_bytes=40 * 1024 * 1024):
    """Pallas implementation of Gate.forward (inference dropout semantics).

    focal: (..., Df), extra: (..., De) with identical leading dims.
    wf: (Df, D), bf: (D,), we: (De, D), with D == Df (square linear).
    On v6e/v7x pass matmul_dtype=jnp.bfloat16 for the native MXU rate
    (weights are pre-cast once in the wrapper; numerics loosen to ~1e-2).
    """
    *lead, Df = focal.shape
    De = extra.shape[-1]
    D = wf.shape[1]
    assert wf.shape == (Df, D), (wf.shape, Df, D)
    assert we.shape == (De, D), (we.shape, De, D)
    assert Df == D, "square linear: output dim must equal focal feature dim"

    M = 1
    for s in lead:
        M *= s

    focal2 = focal.reshape(M, Df)
    extra2 = extra.reshape(M, De)
    bf2 = bf.reshape(1, D)

    if matmul_dtype is not None:
        # One-time wrapper cast: halves weight HBM/VMEM, removes per-step VPU casts.
        wf = wf.astype(matmul_dtype)
        we = we.astype(matmul_dtype)

    act_bytes = focal.dtype.itemsize
    w_bytes = wf.dtype.itemsize
    sub = _sublane(focal.dtype)

    # Output-dim (lane) tile: full D when small or not 128-aligned, otherwise
    # the largest multiple of 128 <= block_cols that divides D (so the in-kernel
    # focal column slice never goes out of bounds).
    if D <= block_cols or D % 128 != 0:
        tn = D
    else:
        tn = D
        for cand in range(block_cols - block_cols % 128, 0, -128):
            if D % cand == 0:
                tn = cand
                break

    # Row tile: as large as the VMEM budget allows, rounded to sublane packing.
    tm = max(sub, min(int(block_rows), _round_up(M, sub)))
    tm = _round_up(tm, sub)

    def vmem_est(tm_):
        # double-buffered activation/output blocks + double-buffered weight/bias tiles
        return (2 * tm_ * (Df + De + tn) * act_bytes
                + 2 * (Df + De) * tn * w_bytes
                + 2 * 8 * tn * 4)

    while tm > sub and vmem_est(tm) > vmem_budget_bytes:
        tm = _round_up(max(sub, tm // 2), sub)

    # v7x has 2 TensorCores: keep at least 2 parallel grid steps when possible.
    if pl.cdiv(M, tm) * pl.cdiv(D, tn) < 2 and M > sub:
        tm = _round_up(pl.cdiv(M, 2), sub)

    grid = (pl.cdiv(M, tm), pl.cdiv(D, tn))

    kernel = _make_gate_kernel(
        tn, grid[1], low_precision_tail=(focal.dtype.itemsize == 2))

    vmem_limit = int(min(64 * 1024 * 1024,
                         max(32 * 1024 * 1024, vmem_est(tm) * 3 // 2)))

    out = pl.pallas_call(
        kernel,
        out_shape=jax.ShapeDtypeStruct((M, D), focal.dtype),
        grid_spec=pltpu.PrefetchScalarGridSpec(
            num_scalar_prefetch=0,
            grid=grid,
            in_specs=[
                pl.BlockSpec((tm, Df), lambda i, j: (i, 0)),  # focal rows (full K)
                pl.BlockSpec((tm, De), lambda i, j: (i, 0)),  # extra rows (full K)
                pl.BlockSpec((Df, tn), lambda i, j: (0, j)),  # Wf column tile
                pl.BlockSpec((1, tn), lambda i, j: (0, j)),   # bias column tile
                pl.BlockSpec((De, tn), lambda i, j: (0, j)),  # We column tile
            ],
            out_specs=pl.BlockSpec((tm, tn), lambda i, j: (i, j)),
        ),
        compiler_params=pltpu.CompilerParams(
            dimension_semantics=("parallel", "parallel"),
            vmem_limit_bytes=vmem_limit),
    )(focal2, extra2, wf, bf2, we)

    return out.reshape(*lead, D)


if __name__ == "__main__":
    # Small shapes: batch=2, seq=9 (M=18 -> exercises the ragged last row block,
    # i.e. the removed pad/slice path), focal hidden D=32, extra hidden De=16.
    B, N, D, De = 2, 9, 32, 16

    key = jax.random.PRNGKey(0)
    kf, ke, kwf, kbf, kwe = jax.random.split(key, 5)

    focal = jax.random.normal(kf, (B, N, D), dtype=jnp.float32)
    extra = jax.random.normal(ke, (B, N, De), dtype=jnp.float32)
    # LazySquareLinear weight (D, D) + bias (D,); LazyLinear (De -> D), no bias.
    wf = jax.random.normal(kwf, (D, D), dtype=jnp.float32) * 0.1
    bf = jax.random.normal(kbf, (D,), dtype=jnp.float32) * 0.1
    we = jax.random.normal(kwe, (De, D), dtype=jnp.float32) * 0.1

    # block_rows=8 -> 3 row-block grid steps (last one ragged).  For real sizes
    # use the defaults and matmul_dtype=jnp.bfloat16 on v6e/v7x.
    out = gate(focal, extra, wf, bf, we, block_rows=8, matmul_dtype=None)
    out = jax.block_until_ready(out)

    # Pure-JAX reference (same inference semantics: dropout == identity).
    def ref(focal, extra):
        z = focal @ wf + bf + extra @ we
        g = 1.0 / (1.0 + jnp.exp(-z))
        return g * focal

    ref_out = ref(focal, extra)
    assert out.shape == (B, N, D), out.shape
    # Tolerance loosened slightly for the EUP approx-reciprocal sigmoid.
    assert jnp.allclose(out, ref_out, atol=2e-2, rtol=2e-2), (
        float(jnp.max(jnp.abs(out - ref_out))))

    print("KERNEL_OK")
</pallas_src>

<mosaic_0001>
module attributes {stable_mosaic.version = 11 : i64} {
  func.func @gate_kernel(%arg0: i32, %arg1: i32, %arg2: memref<8x32xf32, #tpu.memory_space<vmem>>, %arg3: memref<8x16xf32, #tpu.memory_space<vmem>>, %arg4: memref<32x32xf32, #tpu.memory_space<vmem>>, %arg5: memref<1x32xf32, #tpu.memory_space<vmem>>, %arg6: memref<16x32xf32, #tpu.memory_space<vmem>>, %arg7: memref<8x32xf32, #tpu.memory_space<vmem>>) attributes {dimension_semantics = [#tpu.dimension_semantics<parallel>, #tpu.dimension_semantics<parallel>], iteration_bounds = array<i64: 3, 1>, scalar_prefetch = 0 : i64, scratch_operands = 0 : i64, tpu.core_type = #tpu.core_type<tc>, window_params = [{transform_indices = @transform_0, window_bounds = array<i64: 8, 32>}, {transform_indices = @transform_1, window_bounds = array<i64: 8, 16>}, {transform_indices = @transform_2, window_bounds = array<i64: 32, 32>}, {transform_indices = @transform_3, window_bounds = array<i64: 1, 32>}, {transform_indices = @transform_4, window_bounds = array<i64: 16, 32>}, {transform_indices = @transform_5, window_bounds = array<i64: 8, 32>}]} {
    %c0 = arith.constant 0 : index
    %c0_0 = arith.constant 0 : index
    %0 = vector.load %arg2[%c0, %c0_0] : memref<8x32xf32, #tpu.memory_space<vmem>>, vector<8x32xf32>
    %c0_1 = arith.constant 0 : index
    %c0_2 = arith.constant 0 : index
    %1 = vector.load %arg3[%c0_1, %c0_2] : memref<8x16xf32, #tpu.memory_space<vmem>>, vector<8x16xf32>
    %c0_3 = arith.constant 0 : index
    %c0_4 = arith.constant 0 : index
    %2 = vector.load %arg4[%c0_3, %c0_4] : memref<32x32xf32, #tpu.memory_space<vmem>>, vector<32x32xf32>
    %c0_5 = arith.constant 0 : index
    %c0_6 = arith.constant 0 : index
    %3 = vector.load %arg6[%c0_5, %c0_6] : memref<16x32xf32, #tpu.memory_space<vmem>>, vector<16x32xf32>
    %cst = arith.constant dense<0.000000e+00> : vector<8x32xf32>
    %4 = tpu.matmul %0, %2, %cst {dimension_numbers = #tpu.dot_dimension_numbers<[1], [0], [0], [1], [0, 0, 1, 1], [], []>} : vector<8x32xf32>, vector<32x32xf32>, vector<8x32xf32> -> vector<8x32xf32>
    %cst_7 = arith.constant dense<0.000000e+00> : vector<8x32xf32>
    %5 = tpu.matmul %1, %3, %cst_7 {dimension_numbers = #tpu.dot_dimension_numbers<[1], [0], [0], [1], [0, 0, 1, 1], [], []>} : vector<8x16xf32>, vector<16x32xf32>, vector<8x32xf32> -> vector<8x32xf32>
    %6 = arith.addf %4, %5 : vector<8x32xf32>
    %c0_8 = arith.constant 0 : index
    %c0_9 = arith.constant 0 : index
    %7 = vector.load %arg5[%c0_8, %c0_9] : memref<1x32xf32, #tpu.memory_space<vmem>>, vector<1x32xf32>
    %8 = vector.broadcast %7 : vector<1x32xf32> to vector<8x32xf32>
    %9 = arith.addf %6, %8 : vector<8x32xf32>
    %cst_10 = arith.constant 0.000000e+00 : f32
    %10 = vector.broadcast %cst_10 : f32 to vector<8x32xf32>
    %11 = arith.subf %10, %9 : vector<8x32xf32>
    %12 = math.exp %11 : vector<8x32xf32>
    %cst_11 = arith.constant 1.000000e+00 : f32
    %13 = vector.broadcast %cst_11 : f32 to vector<8x32xf32>
    %14 = arith.addf %13, %12 : vector<8x32xf32>
    %15 = tpu.reciprocal %14 {approx = true} : vector<8x32xf32> -> vector<8x32xf32>
    %16 = arith.mulf %15, %0 : vector<8x32xf32>
    %c0_12 = arith.constant 0 : index
    %c0_13 = arith.constant 0 : index
    %17 = vector.load %arg7[%c0_12, %c0_13] : memref<8x32xf32, #tpu.memory_space<vmem>>, vector<8x32xf32>
    tpu.vector_store %arg7[%c0_12, %c0_13], %16 {strides = array<i32>} : memref<8x32xf32, #tpu.memory_space<vmem>>, vector<8x32xf32>,
    return
  }
  func.func @transform_0(%arg0: i32, %arg1: i32) -> (i32, i32) {
    %c0_i32 = arith.constant 0 : i32
    %c0_i32_0 = arith.constant 0 : i32
    return %arg0, %c0_i32 : i32, i32
  }
  func.func @transform_1(%arg0: i32, %arg1: i32) -> (i32, i32) {
    %c0_i32 = arith.constant 0 : i32
    %c0_i32_0 = arith.constant 0 : i32
    return %arg0, %c0_i32 : i32, i32
  }
  func.func @transform_2(%arg0: i32, %arg1: i32) -> (i32, i32) {
    %c0_i32 = arith.constant 0 : i32
    %c0_i32_0 = arith.constant 0 : i32
    return %c0_i32, %arg1 : i32, i32
  }
  func.func @transform_3(%arg0: i32, %arg1: i32) -> (i32, i32) {
    %c0_i32 = arith.constant 0 : i32
    %c0_i32_0 = arith.constant 0 : i32
    return %c0_i32, %arg1 : i32, i32
  }
  func.func @transform_4(%arg0: i32, %arg1: i32) -> (i32, i32) {
    %c0_i32 = arith.constant 0 : i32
    %c0_i32_0 = arith.constant 0 : i32
    return %c0_i32, %arg1 : i32, i32
  }
  func.func @transform_5(%arg0: i32, %arg1: i32) -> (i32, i32) {
    %c0_i32 = arith.constant 0 : i32
    return %arg0, %arg1 : i32, i32
  }
}

</mosaic_0001>

<bundles_post_ra>
// kernel: tpu_custom_call.1
= control target key start
LH: loop header
LB: loop body
LE: loop exit
PB: predicated region body
PF: predicated region fallthrough
CT: control target
= control target key end

     0   :  { %10 = vsyncpa [#allocation3], 0  ;;  %s991_s0 = inlined_call_operand.hbm [shape: f32[18,32], index: 0, kind: input, shape index: {}]   ;;  %s992_s1 = inlined_call_operand.vmem [shape: f32[18,16], index: 1, kind: input, shape index: {}]   ;;  %s993_s2 = inlined_call_operand.vmem [shape: f32[32,32], index: 2, kind: input, shape index: {}]   ;;  %s994_s3 = inlined_call_operand.vmem [shape: f32[1,32], index: 3, kind: input, shape index: {}]   ;;  %s995_s4 = inlined_call_operand.hbm [shape: f32[16,32], index: 4, kind: input, shape index: {}]   ;;  %s996_s5 = inlined_call_operand.hbm [shape: f32[18,32], index: 5, kind: output, shape index: {}]  }
   0x1   :  { %12 = vsyncpa [#allocation3 + $0x1], 0 }
   0x2   :  { %13 = vsyncpa [#allocation6], 0 }
   0x3   :  { %14 = vsyncpa [#allocation4], 0 }
   0x4   :  { %16 = vsyncpa [#allocation4 + $0x1], 0  ;;  %s824_s18 = smov 0   ;;  %s826_s19 = smov 0  }
   0x5   :  { %s828_s20 = smov 0   ;;  %s830_s21 = smov 0  }
   0x6   :  { %s832_s22 = smov 0   ;;  %s834_s23 = smov 0  }
   0x7 LB: > { %s543_s24 = sadd.s32 4294967295, %s789_s23   ;;  %p545_p0 = scmp.ge.s32.totalorder %s789_s23, 1  ;;  %s789_s23 = sphi %s834_s23, %s22_s23   ;;  %s785_s22 = sphi %s832_s22, %s1007_s22   ;;  %s781_s21 = sphi %s830_s21, %s1006_s21   ;;  %s777_s20 = sphi %s828_s20, %s1005_s20   ;;  %s773_s19 = sphi %s826_s19, %s1004_s19   ;;  %s769_s18 = sphi %s824_s18, %s1003_s18  }
   0x8   : > { %p856_p1 = scmp.eq.s32.totalorder %s543_s24, 0  ;;  %p197_p2 = scmp.lt.s32.totalorder %s789_s23, 4 }
   0x9   : > { %s223_s28 = sshll.u32 %s995_s4, 4  ;;  %s791_s30 = smov [#allocation5]   ;;  %s224_s28 = int_to_ptr.hbm [resolvable:$true] %s223_s28 }
   0xa   : > { %p864_p3 = pnand %p545_p0, %p197_p2  ;;  %s225_s6 = sshll.u32 %s791_s30, 4  ;;  %s226_s6 = int_to_ptr.vmem [resolvable:$true] %s225_s6 }
   0xb   : > { %s792_s7 = smov 128   ;;  %s793_s8 = smov 8  }
   0xc   : > { %p571_p4 = pneg %p864_p3  ;;  %s544_s9 = sadd.s32 4294967294, %s789_s23  }
   0xd   : > { %s34_s10 = sadd.s32 1, %s785_s22  ;;  %s41_s11 = sadd.s32 1, %s777_s20 }
   0xe   : > { %p572_p5 = pnand %p571_p4, %p856_p1  ;;  %p36_p6 = scmp.ge.s32.totalorder %s34_s10, 3 }
   0xf   : > { %p48_p7 = scmp.ne.s32.totalorder %s777_s20, %s773_s19  ;;  %p49_p8 = scmp.eq.s32.totalorder %s789_s23, 0 }
  0x10   : > { %574 = dma.hbm_to_vmem [thread:$0]  (!%p572_p5), %s224_s28, 256, %s226_s6, [#allocation6], %s792_s7, %s792_s7, %s793_s8  }
  0x11   : > { %p54_p9 = scmp.ne.s32.totalorder %s773_s19, %s769_s18  ;;  %s1009_s10 = smov (%p36_p6, %s34_s10), 0 }
  0x12   : > { %p882_p10 = por %p49_p8, %p48_p7  ;;  %s38_s14 = ssub.s32 %s785_s22, %s1009_s10 }
  0x13   : > { %p888_p11 = por %p856_p1, %p54_p9  ;;  %p184_p12 = scmp.eq.s32.totalorder %s543_s24, 2 }
  0x14   : > { %p39_p13 = scmp.eq.s32.totalorder %s38_s14, 0  ;;  %p190_p0 = scmp.eq.s32.totalorder %s544_s9, 2 }
  0x15   : > { %p894_p2 = por %p184_p12, %p48_p7  ;;  %p584_p4 = scmp.lt.s32.totalorder %s789_s23, 3 }
  0x16   : > { %s900_s16 = scalar_select %p39_p13, %s777_s20, %s41_s11  }
  0x17   : > { %p902_p5 = por %p190_p0, %p54_p9  ;;  %s239_s26 = sand.u32 1, %s777_s20  }
  0x18   : > { %s550_s27 = sshll.u32 %s239_s26, 3  ;;  %s551_s28 = sshll.u32 %s785_s22, 3 }
  0x19   : > { %s247_s24 = scalar_lea.hbm %s991_s0, %s551_s28  ;;  %s243_s7 = scalar_lea.vmem [#allocation2], %s550_s27 }
  0x1a   : > { %s251_s8 = sshll.u32 %s243_s7, 4  ;;  %s249_s9 = sshll.u32 %s247_s24, 4  ;;  %s252_s8 = int_to_ptr.vmem [resolvable:$true] %s251_s8  ;;  %s250_s9 = int_to_ptr.hbm [resolvable:$true] %s249_s9 }
  0x1b   : > { %p576_p6 = pnand %p584_p4, %p882_p10  ;;  %s240_s11 = scalar_lea.sflag [#allocation3], %s239_s26 }
  0x1c   : > { %267 = sbr.rel (%p864_p3) target bundleno = 199 (0xc7), region = 40  ;;  %s916_s14 = sand.u32 (!%p864_p3), 1, %s773_s19  }
  0x1d   : > { %578 = dma.hbm_to_vmem [thread:$0]  (!%p576_p6), %s250_s9, 128, %s252_s8, %s240_s11  }
  0x1e   : > { %s553_s28 = sshll.u32 (!%p864_p3), %s916_s14, 3  ;;  %s270_s27 = scalar_lea.sflag (!%p864_p3), [#allocation3], %s916_s14 }
  0x1f   : > { %s273_s30 = scalar_lea.vmem (!%p864_p3), [#allocation2], %s553_s28 }
  0x21   : > { %756 = dma.done.wait (%p888_p11), %s270_s27, 128  }
  0x22   : > { %758 = vsyncadd (%p888_p11), %s270_s27, 4294967168 }
  0x23   : > { %760 = dma.done.wait (%p856_p1), [#allocation6], 256  }
  0x24   : > { %762 = vsyncadd (%p856_p1), [#allocation6], 4294967040  ;;  %p317_p3 = scmp.lt.s32.totalorder %s781_s21, 2  ;;  %v333_v0 = vld [vmem:[%s993_s2 + $0x18] sm:$0xff]  ;;  %v332_v1 = vld [vmem:[%s993_s2 + $0x10] sm:$0xff]  ;;  %vm336_vm0 = vcmask 130048  }
  0x25   : > { %v335_v2 = vld [vmem:[#allocation5 + $0x8] sm:$0xff]  ;;  %376 = vmatpush.msra.mxu1 %v333_v0  ;;  %v334_v3 = vld [vmem:[#allocation5] sm:$0xff]  ;;  %v331_v4 = vld [vmem:[%s993_s2 + $0x8] sm:$0xff]  ;;  %vm360_vm1 = vcmask 261120   ;;  %s316_s8 = scalar_lea.vmem [#allocation7], %s553_s28  ;;  %s397_s25 = scalar_lea.sflag [#allocation4], %s916_s14 }
  0x26   : > { %s318_s29 = scalar_select %p317_p3, %s781_s21, 2  ;;  %354 = vmatpush.msra.mxu0 %v335_v2  ;;  %v330_v6 = vld [vmem:[%s993_s2] sm:$0xff] }
  0x27   : > { %377 = vmatpush.msra.mxu1 %v332_v1  ;;  %v328_v7 = vld [vmem:[%s273_s30] sm:$0xff]  ;;  %s560_s30 = sshll.u32 %s781_s21, 3  ;;  %s410_s13 = sshll.u32 %s316_s8, 4  ;;  %s411_s13 = int_to_ptr.vmem [resolvable:$true] %s410_s13 }
  0x28   : > { %s556_s12 = sshll.u32 %s318_s29, 3  ;;  %355 = vmatpush.msra.mxu0 %v334_v3  ;;  %v638_v9 = vld [vmem:[%s994_s3] ss:$0 sm:$0xff]  ;;  %s408_s7 = scalar_lea.hbm %s996_s5, %s560_s30 }
  0x29   : > { %s320_s24 = scalar_lea.vmem %s992_s1, %s556_s12  ;;  %378 = vmatpush.msra.mxu1 %v331_v4  ;;  %s412_s9 = sshll.u32 %s408_s7, 4  ;;  %s413_s9 = int_to_ptr.hbm [resolvable:$true] %s412_s9 }
  0x2a   : > { %v329_v5 = vld [vmem:[%s320_s24] sm:$0xff]  ;;  %s717_s11 = sshra.s32 %s413_s9, 4  ;;  %s723_s28 = scalar_lea.hbm %s996_s5, 24  ;;  %s718_s11 = int_to_ptr.hbm [resolvable:$true] %s717_s11 }
  0x2b   : > { %557 = vmatmul.msk.f32.vlgmr.msra.gmra.mxu0 %vm336_vm0, %v329_v5  ;;  %379 = vmatpush.msra.mxu1 %v330_v6  ;;  %s719_s21 = scalar_lea.hbm %s718_s11, 8  ;;  %p724_p9 = scmp.lt.s32.totalorder %s718_s11, %s996_s5 }
  0x2c   : > { %558 = vmatmul.msk.f32.vlgmr.msra.gmra.mxu1 %vm360_vm1, %v328_v7  ;;  %p720_p1 = scmp.ne.s32.totalorder %s718_s11, %s719_s21  ;;  %p725_p10 = scmp.lt.s32.totalorder %s723_s28, %s719_s21 }
  0x2e   : > { %p721_p7 = pnand %p720_p1, %p894_p2  ;;  %p726_p11 = por %p725_p10, %p724_p9 }
  0x30   : > { %p722_p8 = pneg %p721_p7 }
  0x32   : > { %p727_p12 = pnand %p726_p11, %p722_p8 }
  0xa8   : > { %v357_v8 = vpop.f32.mrf.mxu0 }
  0xa9   : > { %v381_v10 = vpop.f32.mrf.mxu1 }
  0xaa   : > { %v382_v11 = vadd.f32 %v381_v10, %v357_v8 }
  0xac   : > { %v388_v12 = vadd.f32 %v638_v9, %v382_v11 }
  0xae   : > { %v389_v13 = vsub.f32 0.0, %v388_v12 }
  0xb0   : > { %v390_v14 = vmul.f32 1.442695, %v389_v13 }
  0xb2   : > { %639 = vpow2.f32 %v390_v14 }
  0xb8   : > { %v640_v15 = vpop.eup %639 }
  0xb9   : > { %v392_v16 = vadd.f32 1.0, %v640_v15 }
  0xbb   : > { %641 = vrcp.f32 %v392_v16 }
  0xc1   : > { %v642_v17 = vpop.eup %641 }
  0xc2   : > { %v394_v18 = vmul.f32 %v642_v17, %v328_v7 }
  0xc4   : > { %395 = vst.msk [vmem:[%s316_s8] sm:$0xff] %vm360_vm1, %v394_v18 }
  0xc5   : > { %730 = shalt.err (!%p727_p12)
}
  0xc6   : > { %569 = dma.vmem_to_hbm [thread:$0]  (%p894_p2), %s411_s13, 128, %s413_s9, %s397_s25  }
  0xc7 PF: > { %p586_p13 = scmp.ge.s32.totalorder %s789_s23, 2  ;;  %s424_s14 = sand.u32 1, %s769_s18  }
  0xc8   : > { %s425_s30 = scalar_lea.sflag [#allocation4], %s424_s14 }
  0xc9   : > { %p580_p0 = pnand %p586_p13, %p902_p5 }
  0xcb   : > { %p581_p4 = pneg %p580_p0 }
  0xcd   : > { %764 = dma.done.wait (%p581_p4), %s425_s30, 128  }
  0xce   : > { %766 = vsyncadd (%p581_p4), %s425_s30, 4294967168  ;;  %s22_s23 = sadd.s32 1, %s789_s23   ;;  %s1003_s18 = smov %s773_s19 }
  0xcf   : > { %p19_p6 = scmp.ge.s32.totalorder %s22_s23, 5   ;;  %s1004_s19 = smov %s777_s20 }
  0xd0   : > { %s1005_s20 = smov %s900_s16  ;;  %s1006_s21 = smov %s785_s22 }
  0xd1   : > { %s1007_s22 = smov %s1009_s10  ;;  %21 = sbr.rel (!%p19_p6) target bundleno = 7 (0x7), region = 99 }
  0xd6   :  { %431 = vsyncpa [#allocation3], 1 }
  0xd7   :  { %433 = vsyncpa [#allocation3 + $0x1], 1 }
  0xd8   :  { %434 = vsyncpa [#allocation6], 1 }
  0xd9   :  { %435 = vsyncpa [#allocation4], 1 }
  0xda   :  { %437 = vsyncpa [#allocation4 + $0x1], 1 }

</bundles_post_ra>
